<compile_context>
chip_gen: v5e
topology: v5e:2x2
jax: 0.10.0
libtpu: 0.0.40
codegen_flags: <defaults>
</compile_context>

<pallas_src>
import functools
import math
import re

import jax
import jax.numpy as jnp
from jax.experimental import pallas as pl
from jax.experimental.pallas import tpu as pltpu


# ----------------------------------------------------------------------------
# __init__ glue: label-string tokenization + table construction (plain JAX/py)
# ----------------------------------------------------------------------------
def clean_str(string: str) -> str:
    """Same tokenization/string cleaning as the PyTorch module."""
    string = string.strip().strip('"')
    string = re.sub("[^A-Za-z0-9(),!?\\.\\'\\`]", ' ', string)
    string = re.sub("\\'s", " 's", string)
    string = re.sub("\\'ve", " 've", string)
    string = re.sub("n\\'t", " n't", string)
    string = re.sub("\\'re", " 're", string)
    string = re.sub("\\'d", " 'd", string)
    string = re.sub("\\'ll", " 'll", string)
    string = re.sub(',', ' ', string)
    string = re.sub('\\.', ' ', string)
    string = re.sub('\\"', ' ', string)
    string = re.sub('!', ' ', string)
    string = re.sub('\\(', ' ', string)
    string = re.sub('\\)', ' ', string)
    string = re.sub('\\?', ' ', string)
    string = re.sub('\\s{2,}', ' ', string)
    return string.strip().lower()


def build_label_embedding_table(vocab_map, embedding_dim, key, padding_index=None):
    """Deterministic re-implementation of EmbeddingLayer.__init__ weight build.

    Matches: kaiming_uniform_(a=0, mode='fan_in', nonlinearity='linear') on a
    (num_unique_label_words, D) word table, then per-label mean of its words'
    rows -> final (V, D) embedding weight.
    """
    all_label_words = []
    label_map_splittedwords = {}
    for label_index in vocab_map.keys():
        each_label = clean_str(vocab_map[label_index])
        words = [w.lower() for w in each_label.split() if len(w) > 1]
        all_label_words += words
        label_map_splittedwords[label_index] = words

    word_to_idx = {}
    for w in all_label_words:
        if w not in word_to_idx:
            word_to_idx[w] = len(word_to_idx)
    num_words = len(word_to_idx)

    # kaiming_uniform_, nonlinearity='linear' => gain=1, fan_in = embedding_dim
    bound = math.sqrt(3.0 / embedding_dim)
    lookup = jax.random.uniform(
        key, (num_words, embedding_dim), minval=-bound, maxval=bound,
        dtype=jnp.float32)
    if padding_index is not None:
        lookup = lookup.at[padding_index].set(0.0)

    rows = []
    for label in sorted(vocab_map.keys()):
        ws = label_map_splittedwords[label]
        if ws:
            idxs = jnp.asarray([word_to_idx[w] for w in ws], dtype=jnp.int32)
            rows.append(jnp.mean(lookup[idxs], axis=0))
        else:
            rows.append(jnp.zeros((embedding_dim,), jnp.float32))
    return jnp.stack(rows, axis=0)  # (V, D)


# ----------------------------------------------------------------------------
# Pallas kernel: token-blocked one-hot gather from a VMEM-resident table
# (+ optional inverted dropout from a streamed uniform block)
# ----------------------------------------------------------------------------
def _round_up(x, m):
    return ((x + m - 1) // m) * m


def _embed_kernel(*refs, apply_dropout, p):
    if apply_dropout:
        ids_ref, u_ref, table_ref, out_ref = refs
    else:
        ids_ref, table_ref, out_ref = refs

    tile_t = ids_ref.shape[0]
    v_pad = table_ref.shape[0]

    ids = ids_ref[...]                                        # (TILE_T, 1) i32
    lane = jax.lax.broadcasted_iota(jnp.int32, (tile_t, v_pad), 1)
    onehot = jnp.where(lane == ids, jnp.float32(1.0), jnp.float32(0.0))

    # Gather as a small MXU matmul against the VMEM-resident padded table.
    rows = jnp.dot(onehot, table_ref[...],
                   preferred_element_type=jnp.float32)        # (TILE_T, D_pad)

    if apply_dropout:
        # Inverted dropout: keep iff u >= p (prob 1-p), scale kept by 1/(1-p).
        keep = u_ref[...] >= jnp.float32(p)
        rows = jnp.where(keep, rows * jnp.float32(1.0 / (1.0 - p)),
                         jnp.float32(0.0))

    out_ref[...] = rows


def embedding_forward(vocab_id_list, table, *, dropout_p=0.0, training=False,
                      rng_key=None):
    """vocab_id_list: int (B, L); table: float32 (V, D) -> float32 (B, L, D)."""
    b, l = vocab_id_list.shape
    v, d = table.shape
    t = b * l

    # Padded / blocked geometry: sublane-dense token tiles, lane-dense D.
    d_pad = _round_up(d, 128)
    v_pad = _round_up(v, 128)
    tile_t = min(512, _round_up(t, 8))
    t_pad = _round_up(t, tile_t)
    num_blocks = t_pad // tile_t

    table_p = jnp.zeros((v_pad, d_pad), jnp.float32)
    table_p = table_p.at[:v, :d].set(table.astype(jnp.float32))

    ids = jnp.zeros((t_pad, 1), jnp.int32)
    ids = ids.at[:t, 0].set(vocab_id_list.reshape(t).astype(jnp.int32))

    apply_dropout = bool(training) and float(dropout_p) > 0.0

    in_specs = [pl.BlockSpec((tile_t, 1), lambda i: (i, 0))]
    inputs = [ids]
    if apply_dropout:
        if rng_key is None:
            rng_key = jax.random.PRNGKey(0)
        u = jax.random.uniform(rng_key, (t_pad, d_pad), dtype=jnp.float32)
        in_specs.append(pl.BlockSpec((tile_t, d_pad), lambda i: (i, 0)))
        inputs.append(u)
    # Full-array block + constant index_map => table stays VMEM-resident.
    in_specs.append(pl.BlockSpec((v_pad, d_pad), lambda i: (0, 0)))
    inputs.append(table_p)

    out_specs = pl.BlockSpec((tile_t, d_pad), lambda i: (i, 0))

    kernel = functools.partial(_embed_kernel,
                               apply_dropout=apply_dropout,
                               p=float(dropout_p))

    # Advisory cost model (memory bound) + explicit VMEM budget.
    table_bytes = v_pad * d_pad * 4
    out_tile_bytes = tile_t * d_pad * 4
    bytes_accessed = (t_pad * 4 + table_bytes + t_pad * d_pad * 4
                      + (t_pad * d_pad * 4 if apply_dropout else 0))
    flops = 2 * t_pad * v_pad * d_pad
    vmem_est = (2 * table_bytes                      # resident table (conservative x2)
                + 2 * out_tile_bytes                 # double-buffered output tiles
                + 2 * tile_t * 128 * 4               # ids tiles (lane-padded)
                + (2 * out_tile_bytes if apply_dropout else 0)
                + (4 << 20))                         # margin
    vmem_limit = int(min(128 * 2**20, max(32 * 2**20, vmem_est)))

    out = pl.pallas_call(
        kernel,
        out_shape=jax.ShapeDtypeStruct((t_pad, d_pad), jnp.float32),
        grid=(num_blocks,),
        in_specs=in_specs,
        out_specs=out_specs,
        compiler_params=pltpu.CompilerParams(
            dimension_semantics=("parallel",),
            vmem_limit_bytes=vmem_limit,
        ),
        cost_estimate=pl.CostEstimate(
            flops=flops, transcendentals=0, bytes_accessed=bytes_accessed),
    )(*inputs)

    return out[:t, :d].reshape(b, l, d)


# ----------------------------------------------------------------------------
if __name__ == "__main__":
    key = jax.random.PRNGKey(0)
    k_init, k_ids, k_drop = jax.random.split(key, 3)

    # Small, deterministic "config": 6 hierarchical labels, D=128, B=2, L=8.
    vocab_map = {
        0: "Computer Science",
        1: "Machine Learning",
        2: "Natural Language Processing",
        3: "Computer Vision",
        4: "Data Mining",
        5: "Information Retrieval",
    }
    embedding_dim = 128
    batch, max_length = 2, 8
    dropout_p = 0.1  # config['embedding']['label']['dropout']

    # Build the (V, D) embedding weight exactly as __init__ does.
    emb_table = build_label_embedding_table(vocab_map, embedding_dim, k_init)

    # Deterministic input ids.
    vocab_id_list = jax.random.randint(
        k_ids, (batch, max_length), 0, len(vocab_map), dtype=jnp.int32)

    # --- Eval mode (dropout is identity, deterministic) ----------------------
    out = embedding_forward(vocab_id_list, emb_table,
                            dropout_p=dropout_p, training=False)
    out = jax.block_until_ready(out)

    # Pure-JAX reference check of the gather.
    ref = jnp.take(emb_table, vocab_id_list, axis=0)
    assert out.shape == (batch, max_length, embedding_dim)
    assert out.dtype == jnp.float32
    assert jnp.allclose(out, ref, atol=1e-5, rtol=1e-5)

    # --- Training mode (inverted dropout: entries are 0 or ref/(1-p)) --------
    out_tr = embedding_forward(vocab_id_list, emb_table,
                               dropout_p=dropout_p, training=True,
                               rng_key=k_drop)
    out_tr = jax.block_until_ready(out_tr)
    scaled_ref = ref * (1.0 / (1.0 - dropout_p))
    ok_kept = jnp.isclose(out_tr, scaled_ref, atol=1e-5, rtol=1e-5)
    ok_drop = out_tr == 0.0
    assert bool(jnp.all(ok_kept | ok_drop))
    # Some (but not all) elements should have been dropped at p=0.1.
    n_drop = int(jnp.sum(ok_drop & ~ok_kept))
    assert 0 < n_drop < out_tr.size

    print("KERNEL_OK")
</pallas_src>

<mosaic_0001>
module attributes {stable_mosaic.version = 11 : i64} {
  func.func @_embed_kernel(%arg0: i32, %arg1: memref<16x1xi32, #tpu.memory_space<vmem>>, %arg2: memref<128x128xf32, #tpu.memory_space<vmem>>, %arg3: memref<16x128xf32, #tpu.memory_space<vmem>>) attributes {dimension_semantics = [#tpu.dimension_semantics<parallel>], iteration_bounds = array<i64: 1>, scalar_prefetch = 0 : i64, scratch_operands = 0 : i64, tpu.core_type = #tpu.core_type<tc>, window_params = [{transform_indices = @transform_0, window_bounds = array<i64: 16, 1>}, {pipeline_mode = #tpu.pipeline_mode<synchronous>, transform_indices = @transform_1, window_bounds = array<i64: 128, 128>}, {transform_indices = @transform_2, window_bounds = array<i64: 16, 128>}]} {
    %c0 = arith.constant 0 : index
    %c0_0 = arith.constant 0 : index
    %0 = vector.load %arg1[%c0, %c0_0] : memref<16x1xi32, #tpu.memory_space<vmem>>, vector<16x1xi32>
    %1 = tpu.iota {dimensions = array<i32: 1>} : vector<16x128xi32>
    %2 = vector.broadcast %0 : vector<16x1xi32> to vector<16x128xi32>
    %3 = arith.cmpi eq, %1, %2 : vector<16x128xi32>
    %cst = arith.constant 1.000000e+00 : f32
    %cst_1 = arith.constant 0.000000e+00 : f32
    %4 = vector.broadcast %cst : f32 to vector<16x128xf32>
    %5 = vector.broadcast %cst_1 : f32 to vector<16x128xf32>
    %6 = arith.select %3, %4, %5 : vector<16x128xi1>, vector<16x128xf32>
    %c0_2 = arith.constant 0 : index
    %c0_3 = arith.constant 0 : index
    %7 = vector.load %arg2[%c0_2, %c0_3] : memref<128x128xf32, #tpu.memory_space<vmem>>, vector<128x128xf32>
    %cst_4 = arith.constant dense<0.000000e+00> : vector<16x128xf32>
    %8 = tpu.matmul %6, %7, %cst_4 {dimension_numbers = #tpu.dot_dimension_numbers<[1], [0], [0], [1], [0, 0, 1, 1], [], []>} : vector<16x128xf32>, vector<128x128xf32>, vector<16x128xf32> -> vector<16x128xf32>
    %c0_5 = arith.constant 0 : index
    %c0_6 = arith.constant 0 : index
    %9 = vector.load %arg3[%c0_5, %c0_6] : memref<16x128xf32, #tpu.memory_space<vmem>>, vector<16x128xf32>
    tpu.vector_store %arg3[%c0_5, %c0_6], %8 {strides = array<i32>} : memref<16x128xf32, #tpu.memory_space<vmem>>, vector<16x128xf32>,
    return
  }
  func.func @transform_0(%arg0: i32) -> (i32, i32) {
    %c0_i32 = arith.constant 0 : i32
    %c0_i32_0 = arith.constant 0 : i32
    return %arg0, %c0_i32 : i32, i32
  }
  func.func @transform_1(%arg0: i32) -> (i32, i32) {
    %c0_i32 = arith.constant 0 : i32
    %c0_i32_0 = arith.constant 0 : i32
    %c0_i32_1 = arith.constant 0 : i32
    return %c0_i32, %c0_i32_0 : i32, i32
  }
  func.func @transform_2(%arg0: i32) -> (i32, i32) {
    %c0_i32 = arith.constant 0 : i32
    %c0_i32_0 = arith.constant 0 : i32
    return %arg0, %c0_i32 : i32, i32
  }
}

</mosaic_0001>

<bundles_post_ra>
// kernel: tpu_custom_call.1
= control target key start
LH: loop header
LB: loop body
LE: loop exit
PB: predicated region body
PF: predicated region fallthrough
CT: control target
= control target key end

     0   :  { %7 = vsyncpa [#allocation3], 0  ;;  %s218_s0 = inlined_call_operand.vmem [shape: s32[16,1], index: 0, kind: input, shape index: {}]   ;;  %s219_s1 = inlined_call_operand.hbm [shape: f32[128,128], index: 1, kind: input, shape index: {}]   ;;  %s220_s2 = inlined_call_operand.hbm [shape: f32[16,128], index: 2, kind: output, shape index: {}]  }
   0x1   :  { %8 = vsyncpa [#allocation4], 0  ;;  %s15_s11 = sshll.u32 %s219_s1, 4  ;;  %s179_s12 = smov [#allocation2]   ;;  %s16_s11 = int_to_ptr.hbm [resolvable:$true] %s15_s11 }
   0x2   :  { %s17_s13 = sshll.u32 %s179_s12, 4  ;;  %s180_s14 = smov 128   ;;  %s18_s13 = int_to_ptr.vmem [resolvable:$true] %s17_s13 }
   0x3   :  { %s181_s15 = smov 8  }
   0x4   :  { %23 = dma.hbm_to_vmem [thread:$0]  %s16_s11, 2048, %s18_s13, [#allocation3], %s180_s14, %s180_s14, %s181_s15  }
   0x5   :  { %175 = dma.done.wait [#allocation3], 2048  }
   0x6   :  { %176 = vsyncadd [#allocation3], 4294965248  ;;  %v182_v0 = vmov 0   ;;  %v28_v1 = vld [vmem:[%s218_s0] sm:$0xff]  ;;  %v57_v2 = vld [vmem:[#allocation2 + $0x78] sm:$0xff]  ;;  %v30_v19 = vlaneseq  ;;  %v183_v22 = vmov 1.0  }
   0x7   :  { %126 = vset.pattern.permute.xlu0 %v182_v0  ;;  %58 = vmatpush.msra.mxu0 %v57_v2  ;;  %v56_v3 = vld [vmem:[#allocation2 + $0x70] sm:$0xff]  ;;  %v55_v4 = vld [vmem:[#allocation2 + $0x68] sm:$0xff]  ;;  %v54_v5 = vld [vmem:[#allocation2 + $0x60] sm:$0xff]  ;;  %s89_s22 = sshll.u32 %s220_s2, 4  ;;  %s90_s22 = int_to_ptr.hbm [resolvable:$true] %s89_s22 }
   0x8   :  { %33 = vperm.xlu0 %126, %v28_v1   ;;  %104 = vmatpush.msra.mxu1 %v57_v2  ;;  %v29_v6 = vld [vmem:[%s218_s0 + $0x8] sm:$0xff]  ;;  %v53_v7 = vld [vmem:[#allocation2 + $0x58] sm:$0xff]  ;;  %v52_v8 = vld [vmem:[#allocation2 + $0x50] sm:$0xff]  ;;  %v31_v20 = vand.u32 127, %v30_v19  ;;  %s184_s0 = smov [#allocation5]  }
   0x9   :  { %59 = vmatpush.msra.mxu0 %v56_v3  ;;  %v51_v9 = vld [vmem:[#allocation2 + $0x48] sm:$0xff]  ;;  %v50_v10 = vld [vmem:[#allocation2 + $0x40] sm:$0xff]  ;;  %v49_v11 = vld [vmem:[#allocation2 + $0x38] sm:$0xff]  ;;  %s87_s19 = sshll.u32 %s184_s0, 4  ;;  %s88_s19 = int_to_ptr.vmem [resolvable:$true] %s87_s19 }
   0xa   :  { %105 = vmatpush.msra.mxu1 %v56_v3  ;;  %v48_v12 = vld [vmem:[#allocation2 + $0x30] sm:$0xff]  ;;  %v47_v13 = vld [vmem:[#allocation2 + $0x28] sm:$0xff]  ;;  %v46_v14 = vld [vmem:[#allocation2 + $0x20] sm:$0xff] }
   0xb   :  { %60 = vmatpush.msra.mxu0 %v55_v4  ;;  %v45_v15 = vld [vmem:[#allocation2 + $0x18] sm:$0xff]  ;;  %v44_v16 = vld [vmem:[#allocation2 + $0x10] sm:$0xff]  ;;  %v43_v17 = vld [vmem:[#allocation2 + $0x8] sm:$0xff] }
   0xc   :  { %106 = vmatpush.msra.mxu1 %v55_v4  ;;  %v42_v18 = vld [vmem:[#allocation2] sm:$0xff] }
   0xd   :  { %61 = vmatpush.msra.mxu0 %v54_v5 }
   0xe   :  { %107 = vmatpush.msra.mxu1 %v54_v5 }
   0xf   :  { %62 = vmatpush.msra.mxu0 %v53_v7 }
  0x10   :  { %36 = vperm.xlu0 %126, %v29_v6   ;;  %108 = vmatpush.msra.mxu1 %v53_v7 }
  0x11   :  { %63 = vmatpush.msra.mxu0 %v52_v8 }
  0x12   :  { %109 = vmatpush.msra.mxu1 %v52_v8 }
  0x13   :  { %64 = vmatpush.msra.mxu0 %v51_v9 }
  0x14   :  { %110 = vmatpush.msra.mxu1 %v51_v9 }
  0x15   :  { %65 = vmatpush.msra.mxu0 %v50_v10 }
  0x16   :  { %111 = vmatpush.msra.mxu1 %v50_v10 }
  0x17   :  { %66 = vmatpush.msra.mxu0 %v49_v11 }
  0x18   :  { %112 = vmatpush.msra.mxu1 %v49_v11 }
  0x19   :  { %67 = vmatpush.msra.mxu0 %v48_v12 }
  0x1a   :  { %113 = vmatpush.msra.mxu1 %v48_v12 }
  0x1b   :  { %68 = vmatpush.msra.mxu0 %v47_v13 }
  0x1c   :  { %114 = vmatpush.msra.mxu1 %v47_v13 }
  0x1d   :  { %69 = vmatpush.msra.mxu0 %v46_v14 }
  0x1e   :  { %115 = vmatpush.msra.mxu1 %v46_v14 }
  0x1f   :  { %70 = vmatpush.msra.mxu0 %v45_v15 }
  0x20   :  { %116 = vmatpush.msra.mxu1 %v45_v15 }
  0x21   :  { %71 = vmatpush.msra.mxu0 %v44_v16 }
  0x22   :  { %117 = vmatpush.msra.mxu1 %v44_v16 }
  0x23   :  { %72 = vmatpush.msra.mxu0 %v43_v17 }
  0x24   :  { %118 = vmatpush.msra.mxu1 %v43_v17 }
  0x25   :  { %73 = vmatpush.msra.mxu0 %v42_v18 }
  0x26   :  { %119 = vmatpush.msra.mxu1 %v42_v18 }
  0x7a   :  { %v34_v21 = vpop.permute.xlu0 %33 }
  0x7b   :  { %vm38_vm0 = vcmp.eq.s32.totalorder %v31_v20, %v34_v21 }
  0x7c   :  { %102 = vmatmul.msk.f32.vlgmr.msra.gmra.mxu0 %vm38_vm0, %v183_v22 }
  0x82   :  { %v37_v23 = vpop.permute.xlu0 %36 }
  0x83   :  { %vm39_vm1 = vcmp.eq.s32.totalorder %v31_v20, %v37_v23 }
  0x84   :  { %103 = vmatmul.msk.f32.vlgmr.msra.gmra.mxu1 %vm39_vm1, %v183_v22 }
  0xf9   :  { %v75_v24 = vpop.f32.mrf.mxu0 }
  0xfa   :  { %81 = vst [vmem:[#allocation5] sm:$0xff] %v75_v24 }
 0x101   :  { %v78_v25 = vpop.f32.mrf.mxu1 }
 0x102   :  { %82 = vst [vmem:[#allocation5 + $0x8] sm:$0xff] %v78_v25 }
 0x103   :  { %95 = dma.vmem_to_hbm [thread:$0]  %s88_s19, 256, %s90_s22, [#allocation4], %s180_s14, %s180_s14, %s181_s15  }
 0x104   :  { %177 = dma.done.wait [#allocation4], 256  }
 0x105   :  { %178 = vsyncadd [#allocation4], 4294967040 }
 0x106   :  { %100 = vsyncpa [#allocation3], 1 }
 0x107   :  { %101 = vsyncpa [#allocation4], 1 }

</bundles_post_ra>
